<compile_context>
chip_gen: v7x
topology: tpu7x:2x2x1
jax: 0.10.0
libtpu: 0.0.40
codegen_flags: <defaults>
</compile_context>

<pallas_src>
import functools

import jax
import jax.numpy as jnp
import numpy as np
from jax import lax
from jax.experimental import pallas as pl
from jax.experimental.pallas import tpu as pltpu


# ---------------------------------------------------------------------------
# Tile-size / VMEM-budget selection (generation aware).
# ---------------------------------------------------------------------------
def _round_up(x, m):
    return ((x + m - 1) // m) * m


def _pick_tile(dim, candidates):
    """Largest candidate tile that evenly divides `dim`, else the full dim."""
    for c in candidates:
        if dim % c == 0:
            return c
    return dim  # full extent — always a legal block shape


def _hw_config():
    """Tile candidates + scoped-VMEM cap keyed on detected chip generation."""
    vmem_bytes = 64 << 20          # conservative default if the query fails
    kind = ""
    try:
        kind = jax.devices()[0].device_kind.lower()
    except Exception:
        pass
    try:
        vmem_bytes = int(pltpu.get_tpu_info().vmem_capacity_bytes)
    except Exception:
        pass

    is_v5e = ("v5 lite" in kind) or ("v5e" in kind) or ("v5litepod" in kind)
    if is_v5e:
        # v5e: 1 vst slot, no bf16 VPU/EUP, ~0.8 TB/s HBM — small score tiles.
        return dict(tm=(256, 128, 8), tq=(128,), tkv=(512, 256, 128),
                    vmem_cap=100 << 20)
    if vmem_bytes <= (64 << 20):
        # v7x-class: 64 MiB VMEM per TC, 2 TCs — tight scoped-VMEM cap.
        return dict(tm=(256, 128, 8), tq=(256, 128), tkv=(512, 256, 128),
                    vmem_cap=52 << 20)
    # v6e: 128 MiB VMEM.
    return dict(tm=(512, 256, 128, 8), tq=(256, 128), tkv=(512, 256, 128),
                vmem_cap=100 << 20)


def _vmem_limit(footprint_bytes, cap):
    """Tile-derived scoped-VMEM limit with headroom, clamped to [32 MiB, cap]."""
    return int(min(cap, max(32 << 20, 2 * footprint_bytes + (8 << 20))))


# ---------------------------------------------------------------------------
# Kernel 1: tiled QKV projection  (M, C) x (N, C)^T -> (M, N),  M = B*P,
# N = 3*hd zero-padded up to a multiple of 128 (lane-dense stores).
# ---------------------------------------------------------------------------
def _qkv_proj_kernel_acc(x_ref, w_ref, o_ref, acc_ref):
    @pl.when(pl.program_id(2) == 0)
    def _():
        acc_ref[...] = jnp.zeros_like(acc_ref)

    # Contract x's last dim with w's last dim (no explicit w.T transpose).
    acc_ref[...] += lax.dot_general(
        x_ref[...], w_ref[...],
        dimension_numbers=(((1,), (1,)), ((), ())),
        preferred_element_type=jnp.float32,
    )

    @pl.when(pl.program_id(2) == pl.num_programs(2) - 1)
    def _():
        o_ref[...] = acc_ref[...].astype(o_ref.dtype)


def _qkv_proj_kernel_single(x_ref, w_ref, o_ref):
    # Single K step: no accumulator scratch, no init/finalize gating.
    o_ref[...] = lax.dot_general(
        x_ref[...], w_ref[...],
        dimension_numbers=(((1,), (1,)), ((), ())),
        preferred_element_type=jnp.float32,
    ).astype(o_ref.dtype)


def _qkv_projection(x2d, w, cfg):
    M, C = x2d.shape
    N = w.shape[0]                            # already a multiple of 128
    tm = _pick_tile(M, cfg["tm"])
    tn = _pick_tile(N, (512, 256, 128))
    tc = _pick_tile(C, (1024, 512, 256, 128))

    # Megacore: make sure there are >= 2 parallel grid steps when possible.
    if (M // tm) * (N // tn) < 2:
        for c in (tm // 2, 128, 8):
            if c >= 8 and c % 8 == 0 and M % c == 0 and M // c >= 2:
                tm = c
                break

    itemsize = jnp.dtype(x2d.dtype).itemsize
    k_steps = C // tc
    footprint = itemsize * 2 * (tm * tc + tn * tc + tm * tn) + 4 * tm * tn
    vmem_limit = _vmem_limit(footprint, cfg["vmem_cap"])
    cost = pl.CostEstimate(
        flops=2 * M * N * C,
        transcendentals=0,
        bytes_accessed=(M * C * (N // tn) + N * C * (M // tm) + M * N) * itemsize,
    )

    if k_steps == 1:
        return pl.pallas_call(
            _qkv_proj_kernel_single,
            out_shape=jax.ShapeDtypeStruct((M, N), x2d.dtype),
            grid=(M // tm, N // tn),
            in_specs=[
                pl.BlockSpec((tm, tc), lambda i, j: (i, 0)),
                pl.BlockSpec((tn, tc), lambda i, j: (j, 0)),
            ],
            out_specs=pl.BlockSpec((tm, tn), lambda i, j: (i, j)),
            compiler_params=pltpu.CompilerParams(
                dimension_semantics=("parallel", "parallel"),
                vmem_limit_bytes=vmem_limit,
            ),
            cost_estimate=cost,
        )(x2d, w)

    return pl.pallas_call(
        _qkv_proj_kernel_acc,
        out_shape=jax.ShapeDtypeStruct((M, N), x2d.dtype),
        grid=(M // tm, N // tn, k_steps),
        in_specs=[
            pl.BlockSpec((tm, tc), lambda i, j, k: (i, k)),
            pl.BlockSpec((tn, tc), lambda i, j, k: (j, k)),
        ],
        out_specs=pl.BlockSpec((tm, tn), lambda i, j, k: (i, j)),
        scratch_shapes=[pltpu.VMEM((tm, tn), jnp.float32)],
        compiler_params=pltpu.CompilerParams(
            dimension_semantics=("parallel", "parallel", "arbitrary"),
            vmem_limit_bytes=vmem_limit,
        ),
        cost_estimate=cost,
    )(x2d, w)


# ---------------------------------------------------------------------------
# Kernel 2: flash-style attention (online softmax), lane-dense token layout.
# Inputs are (3*B, hd, P); grid is (B, P//tq, P//tkv) with the kv axis last.
# ---------------------------------------------------------------------------
def _flash_attn_kernel(q_ref, k_ref, v_ref, o_ref, m_sc, l_sc, acc_sc, q_sc,
                       *, scale):
    ki = pl.program_id(2)

    @pl.when(ki == 0)
    def _():
        m_sc[...] = jnp.full_like(m_sc, -jnp.inf)
        l_sc[...] = jnp.zeros_like(l_sc)
        acc_sc[...] = jnp.zeros_like(acc_sc)
        # Softmax scale folded into q once per (b, qi) tile — off the kv loop.
        q_sc[...] = q_ref[0] * scale

    k = k_ref[0]                                  # (hd, tkv)
    # s[kv, q] = sum_d k[d, kv] * q[d, q]: contraction over the sublane (hd)
    # dim; operands, scores and probabilities are lane-dense in the token axes.
    s = lax.dot_general(
        k, q_sc[...], (((0,), (0,)), ((), ())),
        preferred_element_type=jnp.float32,
    )                                             # (tkv, tq) f32

    m_prev = m_sc[...]                            # (1, tq)
    m_new = jnp.maximum(m_prev, jnp.max(s, axis=0, keepdims=True))
    alpha = jnp.exp(m_prev - m_new)               # rescale running sum AND acc
    p = jnp.exp(s - m_new)                        # (tkv, tq), f32 softmax math

    l_sc[...] = alpha * l_sc[...] + jnp.sum(p, axis=0, keepdims=True)
    # acc (hd, tq) += v (hd, tkv) @ p (tkv, tq); f32 accumulation.
    acc_sc[...] = alpha * acc_sc[...] + jnp.dot(
        v_ref[0], p.astype(v_ref.dtype), preferred_element_type=jnp.float32
    )
    m_sc[...] = m_new

    @pl.when(ki == pl.num_programs(2) - 1)
    def _():
        # Exact divide at finalize — runs once per (b, qi) tile, off the hot loop.
        o_ref[0] = (acc_sc[...] / l_sc[...]).astype(o_ref.dtype)


# ---------------------------------------------------------------------------
# Forward pass matching the PyTorch module.
# ---------------------------------------------------------------------------
def attention_forward(x, w, head_dim):
    B, P, C = x.shape
    if C % 3 != 0 or head_dim != C // 3:
        # The module's reshape(3, B, P, C // 3) is only valid in this case and
        # `scale = head_dim ** -0.5` must match the per-head dim actually used.
        raise ValueError(
            f"Attention requires head_dim == embed_dim // 3 (got head_dim="
            f"{head_dim}, embed_dim={C})."
        )
    hd = C // 3
    scale = float(head_dim) ** -0.5
    cfg = _hw_config()

    # --- QKV projection (tiled, pipelined MXU matmul, lane-dense output) ----
    M, N = B * P, 3 * hd
    n_pad = _round_up(N, 128)
    w_p = w if n_pad == N else jnp.pad(w, ((0, n_pad - N), (0, 0)))
    qkv2d = _qkv_projection(x.reshape(M, C), w_p, cfg)          # (M, n_pad)
    if n_pad != N:
        qkv2d = qkv2d[:, :N]                                    # drop zero cols

    # Exact PyTorch semantics: flat row-major reinterpretation of (B*P, 3*hd)
    # as (3, B, P, hd) == (3*B, P, hd) (bitcast; mixes batch elements for B>1,
    # just like the original module).  Then a layout-only transpose so the
    # token axis (the only >= 128 dim) sits on the lane axis in the kernel.
    qkv_t = jnp.swapaxes(qkv2d.reshape(3 * B, P, hd), 1, 2)     # (3*B, hd, P)

    tq = _pick_tile(P, cfg["tq"])
    tkv = _pick_tile(P, cfg["tkv"])
    # Megacore: guarantee >= 2 parallel grid steps when B == 1 if P allows it.
    if B * (P // tq) < 2:
        for c in cfg["tq"]:
            if c <= P // 2 and P % c == 0:
                tq = c
                break

    itemsize = jnp.dtype(x.dtype).itemsize
    n_q_tiles = P // tq
    footprint = (itemsize * 2 * (2 * hd * tq + 2 * hd * tkv)   # dbl-buffered io
                 + 4 * (2 * tq + hd * tq)                      # m, l, acc scratch
                 + itemsize * hd * tq                          # hoisted q tile
                 + 3 * 4 * tq * tkv)                           # s / p temporaries
    vmem_limit = _vmem_limit(footprint, cfg["vmem_cap"])

    out_t = pl.pallas_call(
        functools.partial(_flash_attn_kernel, scale=scale),
        out_shape=jax.ShapeDtypeStruct((B, hd, P), x.dtype),
        grid=(B, P // tq, P // tkv),
        in_specs=[
            # q block: rows [0, B) of the leading (3*B) axis.
            pl.BlockSpec((1, hd, tq), lambda b, qi, ki: (b, 0, qi)),
            # k block: rows [B, 2B).
            pl.BlockSpec((1, hd, tkv), lambda b, qi, ki: (B + b, 0, ki)),
            # v block: rows [2B, 3B).
            pl.BlockSpec((1, hd, tkv), lambda b, qi, ki: (2 * B + b, 0, ki)),
        ],
        out_specs=pl.BlockSpec((1, hd, tq), lambda b, qi, ki: (b, 0, qi)),
        scratch_shapes=[
            pltpu.VMEM((1, tq), jnp.float32),     # running max
            pltpu.VMEM((1, tq), jnp.float32),     # running sum
            pltpu.VMEM((hd, tq), jnp.float32),    # f32 output accumulator
            pltpu.VMEM((hd, tq), x.dtype),        # hoisted scaled q tile
        ],
        compiler_params=pltpu.CompilerParams(
            dimension_semantics=("parallel", "parallel", "arbitrary"),
            vmem_limit_bytes=vmem_limit,
        ),
        cost_estimate=pl.CostEstimate(
            flops=4 * B * P * P * hd,
            transcendentals=B * P * P,
            # q read once, k/v re-read once per q tile, output written once.
            bytes_accessed=B * P * hd * (2 + 2 * n_q_tiles) * itemsize,
        ),
    )(qkv_t, qkv_t, qkv_t)

    return jnp.swapaxes(out_t, 1, 2)              # (B, P, hd)


# ---------------------------------------------------------------------------
# Pure-JAX reference (mirrors the PyTorch forward exactly) for verification.
# ---------------------------------------------------------------------------
def attention_ref(x, w, head_dim):
    B, P, C = x.shape
    hp = lax.Precision.HIGHEST
    qkv = jnp.dot(x, w.T, precision=hp).reshape(3, B, P, C // 3)
    q, k, v = qkv[0], qkv[1], qkv[2]
    scale = head_dim ** (-0.5)
    s = jnp.einsum("bpd,bqd->bpq", q, k, precision=hp) * scale
    a = jax.nn.softmax(s, axis=-1)
    return jnp.einsum("bpq,bqd->bpd", a, v, precision=hp)


if __name__ == "__main__":
    # Small shapes consistent with the module: head_dim == embed_dim // 3.
    B, P = 2, 8
    embed_dim, head_dim = 48, 16

    key = jax.random.PRNGKey(0)
    kx, kw = jax.random.split(key)
    x = jax.random.normal(kx, (B, P, embed_dim), dtype=jnp.float32)
    # nn.Linear(embed_dim, head_dim * 3, bias=False) weight: (3*head_dim, embed_dim)
    w = jax.random.normal(kw, (head_dim * 3, embed_dim), dtype=jnp.float32)
    w = w * (embed_dim ** -0.5)

    fwd = jax.jit(attention_forward, static_argnums=2)
    out = jax.block_until_ready(fwd(x, w, head_dim))

    ref = attention_ref(x, w, head_dim)
    assert out.shape == (B, P, embed_dim // 3), out.shape
    # f32 operands + exact divide at finalize -> tight tolerance.
    np.testing.assert_allclose(np.asarray(out), np.asarray(ref),
                               rtol=5e-5, atol=1e-5)

    print("KERNEL_OK")
</pallas_src>

<mosaic_0001>
module attributes {stable_mosaic.version = 11 : i64} {
  func.func @_qkv_proj_kernel_single(%arg0: i32, %arg1: i32, %arg2: memref<8x48xf32, #tpu.memory_space<vmem>>, %arg3: memref<128x48xf32, #tpu.memory_space<vmem>>, %arg4: memref<8x128xf32, #tpu.memory_space<vmem>>) attributes {dimension_semantics = [#tpu.dimension_semantics<parallel>, #tpu.dimension_semantics<parallel>], iteration_bounds = array<i64: 2, 1>, scalar_prefetch = 0 : i64, scratch_operands = 0 : i64, tpu.core_type = #tpu.core_type<tc>, window_params = [{transform_indices = @transform_0, window_bounds = array<i64: 8, 48>}, {transform_indices = @transform_1, window_bounds = array<i64: 128, 48>}, {transform_indices = @transform_2, window_bounds = array<i64: 8, 128>}]} {
    %c0 = arith.constant 0 : index
    %c0_0 = arith.constant 0 : index
    %0 = vector.load %arg2[%c0, %c0_0] : memref<8x48xf32, #tpu.memory_space<vmem>>, vector<8x48xf32>
    %c0_1 = arith.constant 0 : index
    %c0_2 = arith.constant 0 : index
    %1 = vector.load %arg3[%c0_1, %c0_2] : memref<128x48xf32, #tpu.memory_space<vmem>>, vector<128x48xf32>
    %cst = arith.constant dense<0.000000e+00> : vector<8x128xf32>
    %2 = tpu.matmul %0, %1, %cst {dimension_numbers = #tpu.dot_dimension_numbers<[1], [1], [0], [0], [0, 0, 1, 0], [], []>} : vector<8x48xf32>, vector<128x48xf32>, vector<8x128xf32> -> vector<8x128xf32>
    %c0_3 = arith.constant 0 : index
    %c0_4 = arith.constant 0 : index
    %3 = vector.load %arg4[%c0_3, %c0_4] : memref<8x128xf32, #tpu.memory_space<vmem>>, vector<8x128xf32>
    tpu.vector_store %arg4[%c0_3, %c0_4], %2 {strides = array<i32>} : memref<8x128xf32, #tpu.memory_space<vmem>>, vector<8x128xf32>,
    return
  }
  func.func @transform_0(%arg0: i32, %arg1: i32) -> (i32, i32) {
    %c0_i32 = arith.constant 0 : i32
    %c0_i32_0 = arith.constant 0 : i32
    return %arg0, %c0_i32 : i32, i32
  }
  func.func @transform_1(%arg0: i32, %arg1: i32) -> (i32, i32) {
    %c0_i32 = arith.constant 0 : i32
    %c0_i32_0 = arith.constant 0 : i32
    return %arg1, %c0_i32 : i32, i32
  }
  func.func @transform_2(%arg0: i32, %arg1: i32) -> (i32, i32) {
    %c0_i32 = arith.constant 0 : i32
    return %arg0, %arg1 : i32, i32
  }
}

module attributes {stable_mosaic.version = 11 : i64} {
  func.func @_flash_attn_kernel(%arg0: i32, %arg1: i32, %arg2: i32, %arg3: memref<1x16x8xf32, #tpu.memory_space<vmem>>, %arg4: memref<1x16x8xf32, #tpu.memory_space<vmem>>, %arg5: memref<1x16x8xf32, #tpu.memory_space<vmem>>, %arg6: memref<1x16x8xf32, #tpu.memory_space<vmem>>, %arg7: memref<1x8xf32, #tpu.memory_space<vmem>>, %arg8: memref<1x8xf32, #tpu.memory_space<vmem>>, %arg9: memref<16x8xf32, #tpu.memory_space<vmem>>, %arg10: memref<16x8xf32, #tpu.memory_space<vmem>>) attributes {dimension_semantics = [#tpu.dimension_semantics<parallel>, #tpu.dimension_semantics<parallel>, #tpu.dimension_semantics<arbitrary>], iteration_bounds = array<i64: 2, 1, 1>, scalar_prefetch = 0 : i64, scratch_operands = 4 : i64, tpu.core_type = #tpu.core_type<tc>, window_params = [{transform_indices = @transform_0, window_bounds = array<i64: 1, 16, 8>}, {transform_indices = @transform_1, window_bounds = array<i64: 1, 16, 8>}, {transform_indices = @transform_2, window_bounds = array<i64: 1, 16, 8>}, {transform_indices = @transform_3, window_bounds = array<i64: 1, 16, 8>}]} {
    %c0_i32 = arith.constant 0 : i32
    %0 = arith.cmpi eq, %arg2, %c0_i32 : i32
    %1 = arith.extui %0 : i1 to i32
    %c0_i32_0 = arith.constant 0 : i32
    %2 = arith.cmpi ne, %1, %c0_i32_0 : i32
    scf.if %2 {
      %cst_25 = arith.constant 0xFF800000 : f32
      %34 = vector.broadcast %cst_25 : f32 to vector<1x8xf32>
      %c0_26 = arith.constant 0 : index
      %c0_27 = arith.constant 0 : index
      %35 = vector.load %arg7[%c0_26, %c0_27] : memref<1x8xf32, #tpu.memory_space<vmem>>, vector<1x8xf32>
      tpu.vector_store %arg7[%c0_26, %c0_27], %34 {strides = array<i32>} : memref<1x8xf32, #tpu.memory_space<vmem>>, vector<1x8xf32>,
      %cst_28 = arith.constant 0.000000e+00 : f32
      %36 = vector.broadcast %cst_28 : f32 to vector<1x8xf32>
      %c0_29 = arith.constant 0 : index
      %c0_30 = arith.constant 0 : index
      %37 = vector.load %arg8[%c0_29, %c0_30] : memref<1x8xf32, #tpu.memory_space<vmem>>, vector<1x8xf32>
      tpu.vector_store %arg8[%c0_29, %c0_30], %36 {strides = array<i32>} : memref<1x8xf32, #tpu.memory_space<vmem>>, vector<1x8xf32>,
      %cst_31 = arith.constant 0.000000e+00 : f32
      %38 = vector.broadcast %cst_31 : f32 to vector<16x8xf32>
      %c0_32 = arith.constant 0 : index
      %c0_33 = arith.constant 0 : index
      %39 = vector.load %arg9[%c0_32, %c0_33] : memref<16x8xf32, #tpu.memory_space<vmem>>, vector<16x8xf32>
      tpu.vector_store %arg9[%c0_32, %c0_33], %38 {strides = array<i32>} : memref<16x8xf32, #tpu.memory_space<vmem>>, vector<16x8xf32>,
      %c0_34 = arith.constant 0 : index
      %c0_35 = arith.constant 0 : index
      %c0_36 = arith.constant 0 : index
      %40 = vector.load %arg3[%c0_34, %c0_35, %c0_36] : memref<1x16x8xf32, #tpu.memory_space<vmem>>, vector<1x16x8xf32>
      %41 = vector.shape_cast %40 : vector<1x16x8xf32> to vector<16x8xf32>
      %cst_37 = arith.constant 2.500000e-01 : f32
      %42 = vector.broadcast %cst_37 : f32 to vector<16x8xf32>
      %43 = arith.mulf %41, %42 : vector<16x8xf32>
      %c0_38 = arith.constant 0 : index
      %c0_39 = arith.constant 0 : index
      %44 = vector.load %arg10[%c0_38, %c0_39] : memref<16x8xf32, #tpu.memory_space<vmem>>, vector<16x8xf32>
      tpu.vector_store %arg10[%c0_38, %c0_39], %43 {strides = array<i32>} : memref<16x8xf32, #tpu.memory_space<vmem>>, vector<16x8xf32>,
    } else {
    }
    %c0 = arith.constant 0 : index
    %c0_1 = arith.constant 0 : index
    %c0_2 = arith.constant 0 : index
    %3 = vector.load %arg4[%c0, %c0_1, %c0_2] : memref<1x16x8xf32, #tpu.memory_space<vmem>>, vector<1x16x8xf32>
    %4 = vector.shape_cast %3 : vector<1x16x8xf32> to vector<16x8xf32>
    %c0_3 = arith.constant 0 : index
    %c0_4 = arith.constant 0 : index
    %5 = vector.load %arg10[%c0_3, %c0_4] : memref<16x8xf32, #tpu.memory_space<vmem>>, vector<16x8xf32>
    %cst = arith.constant dense<0.000000e+00> : vector<8x8xf32>
    %6 = tpu.matmul %4, %5, %cst {dimension_numbers = #tpu.dot_dimension_numbers<[0], [0], [1], [1], [0, 1, 1, 1], [], []>} : vector<16x8xf32>, vector<16x8xf32>, vector<8x8xf32> -> vector<8x8xf32>
    %c0_5 = arith.constant 0 : index
    %c0_6 = arith.constant 0 : index
    %7 = vector.load %arg7[%c0_5, %c0_6] : memref<1x8xf32, #tpu.memory_space<vmem>>, vector<1x8xf32>
    %cst_7 = arith.constant dense<0xFF800000> : vector<8xf32>
    %8 = vector.multi_reduction <maximumf>, %6, %cst_7 [0] : vector<8x8xf32> to vector<8xf32>
    %9 = vector.shape_cast %8 : vector<8xf32> to vector<1x8xf32>
    %10 = arith.maximumf %7, %9 : vector<1x8xf32>
    %11 = arith.subf %7, %10 : vector<1x8xf32>
    %12 = math.exp %11 : vector<1x8xf32>
    %13 = vector.broadcast %10 : vector<1x8xf32> to vector<8x8xf32>
    %14 = arith.subf %6, %13 : vector<8x8xf32>
    %15 = math.exp %14 : vector<8x8xf32>
    %c0_8 = arith.constant 0 : index
    %c0_9 = arith.constant 0 : index
    %16 = vector.load %arg8[%c0_8, %c0_9] : memref<1x8xf32, #tpu.memory_space<vmem>>, vector<1x8xf32>
    %17 = arith.mulf %12, %16 : vector<1x8xf32>
    %cst_10 = arith.constant dense<0.000000e+00> : vector<8xf32>
    %18 = vector.multi_reduction <add>, %15, %cst_10 [0] : vector<8x8xf32> to vector<8xf32>
    %19 = vector.shape_cast %18 : vector<8xf32> to vector<1x8xf32>
    %20 = arith.addf %17, %19 : vector<1x8xf32>
    %c0_11 = arith.constant 0 : index
    %c0_12 = arith.constant 0 : index
    %21 = vector.load %arg8[%c0_11, %c0_12] : memref<1x8xf32, #tpu.memory_space<vmem>>, vector<1x8xf32>
    tpu.vector_store %arg8[%c0_11, %c0_12], %20 {strides = array<i32>} : memref<1x8xf32, #tpu.memory_space<vmem>>, vector<1x8xf32>,
    %c0_13 = arith.constant 0 : index
    %c0_14 = arith.constant 0 : index
    %22 = vector.load %arg9[%c0_13, %c0_14] : memref<16x8xf32, #tpu.memory_space<vmem>>, vector<16x8xf32>
    %23 = vector.broadcast %12 : vector<1x8xf32> to vector<16x8xf32>
    %24 = arith.mulf %23, %22 : vector<16x8xf32>
    %c0_15 = arith.constant 0 : index
    %c0_16 = arith.constant 0 : index
    %c0_17 = arith.constant 0 : index
    %25 = vector.load %arg5[%c0_15, %c0_16, %c0_17] : memref<1x16x8xf32, #tpu.memory_space<vmem>>, vector<1x16x8xf32>
    %26 = vector.shape_cast %25 : vector<1x16x8xf32> to vector<16x8xf32>
    %cst_18 = arith.constant dense<0.000000e+00> : vector<16x8xf32>
    %27 = tpu.matmul %26, %15, %cst_18 {dimension_numbers = #tpu.dot_dimension_numbers<[1], [0], [0], [1], [0, 0, 1, 1], [], []>} : vector<16x8xf32>, vector<8x8xf32>, vector<16x8xf32> -> vector<16x8xf32>
    %28 = arith.addf %24, %27 : vector<16x8xf32>
    %c0_19 = arith.constant 0 : index
    %c0_20 = arith.constant 0 : index
    %29 = vector.load %arg9[%c0_19, %c0_20] : memref<16x8xf32, #tpu.memory_space<vmem>>, vector<16x8xf32>
    tpu.vector_store %arg9[%c0_19, %c0_20], %28 {strides = array<i32>} : memref<16x8xf32, #tpu.memory_space<vmem>>, vector<16x8xf32>,
    %c0_21 = arith.constant 0 : index
    %c0_22 = arith.constant 0 : index
    %30 = vector.load %arg7[%c0_21, %c0_22] : memref<1x8xf32, #tpu.memory_space<vmem>>, vector<1x8xf32>
    tpu.vector_store %arg7[%c0_21, %c0_22], %10 {strides = array<i32>} : memref<1x8xf32, #tpu.memory_space<vmem>>, vector<1x8xf32>,
    %c0_i32_23 = arith.constant 0 : i32
    %31 = arith.cmpi eq, %arg2, %c0_i32_23 : i32
    %32 = arith.extui %31 : i1 to i32
    %c0_i32_24 = arith.constant 0 : i32
    %33 = arith.cmpi ne, %32, %c0_i32_24 : i32
    scf.if %33 {
      %c0_25 = arith.constant 0 : index
      %c0_26 = arith.constant 0 : index
      %34 = vector.load %arg9[%c0_25, %c0_26] : memref<16x8xf32, #tpu.memory_space<vmem>>, vector<16x8xf32>
      %c0_27 = arith.constant 0 : index
      %c0_28 = arith.constant 0 : index
      %35 = vector.load %arg8[%c0_27, %c0_28] : memref<1x8xf32, #tpu.memory_space<vmem>>, vector<1x8xf32>
      %36 = vector.broadcast %35 : vector<1x8xf32> to vector<16x8xf32>
      %37 = arith.divf %34, %36 : vector<16x8xf32>
      %c0_29 = arith.constant 0 : index
      %c0_30 = arith.constant 0 : index
      %c0_31 = arith.constant 0 : index
      %38 = vector.load %arg6[%c0_29, %c0_30, %c0_31] : memref<1x16x8xf32, #tpu.memory_space<vmem>>, vector<1x16x8xf32>
      %39 = vector.shape_cast %38 : vector<1x16x8xf32> to vector<16x8xf32>
      %40 = vector.shape_cast %37 : vector<16x8xf32> to vector<1x16x8xf32>
      tpu.vector_store %arg6[%c0_29, %c0_30, %c0_31], %40 {strides = array<i32>} : memref<1x16x8xf32, #tpu.memory_space<vmem>>, vector<1x16x8xf32>,
    } else {
    }
    return
  }
  func.func @transform_0(%arg0: i32, %arg1: i32, %arg2: i32) -> (i32, i32, i32) {
    %c0_i32 = arith.constant 0 : i32
    %c0_i32_0 = arith.constant 0 : i32
    return %arg0, %c0_i32, %arg1 : i32, i32, i32
  }
  func.func @transform_1(%arg0: i32, %arg1: i32, %arg2: i32) -> (i32, i32, i32) {
    %c2_i32 = arith.constant 2 : i32
    %0 = arith.addi %c2_i32, %arg0 : i32
    %c0_i32 = arith.constant 0 : i32
    %c0_i32_0 = arith.constant 0 : i32
    return %0, %c0_i32, %arg2 : i32, i32, i32
  }
  func.func @transform_2(%arg0: i32, %arg1: i32, %arg2: i32) -> (i32, i32, i32) {
    %c4_i32 = arith.constant 4 : i32
    %0 = arith.addi %c4_i32, %arg0 : i32
    %c0_i32 = arith.constant 0 : i32
    %c0_i32_0 = arith.constant 0 : i32
    return %0, %c0_i32, %arg2 : i32, i32, i32
  }
  func.func @transform_3(%arg0: i32, %arg1: i32, %arg2: i32) -> (i32, i32, i32) {
    %c0_i32 = arith.constant 0 : i32
    %c0_i32_0 = arith.constant 0 : i32
    return %arg0, %c0_i32, %arg1 : i32, i32, i32
  }
}

</mosaic_0001>

<bundles_post_ra>
// kernel: attention_forward.2
= control target key start
LH: loop header
LB: loop body
LE: loop exit
PB: predicated region body
PF: predicated region fallthrough
CT: control target
= control target key end

     0   :  { %s588_s9 = smov 0   ;;  %s590_s10 = smov 0   ;;  %s696_s0 = inlined_call_operand.vmem [shape: f32[16,48], index: 0, kind: input, shape index: {}]   ;;  %s697_s1 = inlined_call_operand.vmem [shape: f32[128,48], index: 1, kind: input, shape index: {}]   ;;  %s698_s2 = inlined_call_operand.vmem [shape: f32[16,128], index: 2, kind: output, shape index: {}]  }
   0x1   :  { %s592_s11 = smov 0  }
   0x2 LB: > { %s24_s12 = sadd.s32 1, %s564_s10  ;;  %p413_p0 = scmp.ge.s32.totalorder %s568_s11, 1  ;;  %s568_s11 = sphi %s592_s11, %s12_s11   ;;  %s564_s10 = sphi %s590_s10, %s702_s10   ;;  %s560_s9 = sphi %s588_s9, %s701_s9  }
   0x3   : > { %p26_p1 = scmp.ge.s32.totalorder %s24_s12, 2  ;;  %p136_p2 = scmp.lt.s32.totalorder %s568_s11, 3 }
   0x5   : > { %s704_s12 = smov (%p26_p1, %s24_s12), 0  ;;  %p137_p3 = pnand %p413_p0, %p136_p2 }
   0x6   : > { %v182_v0 = vld [vmem:[%s697_s1] sm:$0xff] (!%p137_p3)  ;;  %v183_v1 = vld [vmem:[%s697_s1 + $0x8] sm:$0xff] (!%p137_p3)  ;;  %vm198_vm0 = vcmask (!%p137_p3), 392192   ;;  %v570_v2 = vmov (!%p137_p3), 0.0|0.0   ;;  %vm571_vm2 = vmmov (!%p137_p3), 0   ;;  %v572_v5 = vmov (!%p137_p3), 0.0  }
   0x7   : > { %140 = sbr.rel (%p137_p3) target bundleno = 285 (0x11d), region = 28  ;;  %487 = vmatprep.subr.bf16.mxu0 (!%p137_p3), %v570_v2  ;;  %v488_v3 = vpack.c.bf16 (!%p137_p3), %v183_v1, %v182_v0  ;;  %vm616_vm1 = vmpackc.low (!%p137_p3), %vm198_vm0, %vm198_vm0  ;;  %484 = vmatprep.mubr.msk.f32.mxu0 (!%p137_p3), %vm571_vm2, %v572_v5  ;;  %v184_v6 = vld [vmem:[%s697_s1 + $0x10] sm:$0xff] (!%p137_p3)  ;;  %v185_v7 = vld [vmem:[%s697_s1 + $0x18] sm:$0xff] (!%p137_p3)  ;;  %p164_p4 = scmp.lt.s32.totalorder (!%p137_p3), %s560_s9, 1 }
   0x8   : > { %v492_v8 = vpack.c.bf16 (!%p137_p3), %v185_v7, %v184_v6  ;;  %v186_v9 = vld [vmem:[%s697_s1 + $0x20] sm:$0xff] (!%p137_p3)  ;;  %v187_v10 = vld [vmem:[%s697_s1 + $0x28] sm:$0xff] (!%p137_p3)  ;;  %v188_v12 = vld [vmem:[%s697_s1 + $0x30] sm:$0xff] (!%p137_p3) }
   0x9   : > { %490 = vmatpush3.bf16.xpose.msk.msra.mxu0 (!%p137_p3), %vm616_vm1, %v488_v3  ;;  %v496_v11 = vpack.c.bf16 (!%p137_p3), %v187_v10, %v186_v9  ;;  %v189_v13 = vld [vmem:[%s697_s1 + $0x38] sm:$0xff] (!%p137_p3)  ;;  %v190_v15 = vld [vmem:[%s697_s1 + $0x40] sm:$0xff] (!%p137_p3)  ;;  %v191_v16 = vld [vmem:[%s697_s1 + $0x48] sm:$0xff] (!%p137_p3) }
   0xa   : > { %491 = vmatprep.subr.bf16.mxu0 (!%p137_p3), %v570_v2  ;;  %v500_v14 = vpack.c.bf16 (!%p137_p3), %v189_v13, %v188_v12  ;;  %v504_v17 = vpack.c.bf16 (!%p137_p3), %v191_v16, %v190_v15  ;;  %v192_v18 = vld [vmem:[%s697_s1 + $0x50] sm:$0xff] (!%p137_p3)  ;;  %v193_v19 = vld [vmem:[%s697_s1 + $0x58] sm:$0xff] (!%p137_p3)  ;;  %v194_v21 = vld [vmem:[%s697_s1 + $0x60] sm:$0xff] (!%p137_p3) }
   0xb   : > { %v508_v20 = vpack.c.bf16 (!%p137_p3), %v193_v19, %v192_v18  ;;  %v195_v22 = vld [vmem:[%s697_s1 + $0x68] sm:$0xff] (!%p137_p3)  ;;  %v196_v24 = vld [vmem:[%s697_s1 + $0x70] sm:$0xff] (!%p137_p3)  ;;  %v197_v25 = vld [vmem:[%s697_s1 + $0x78] sm:$0xff] (!%p137_p3) }
   0xc   : > { %v512_v23 = vpack.c.bf16 (!%p137_p3), %v195_v22, %v194_v21  ;;  %v516_v26 = vpack.c.bf16 (!%p137_p3), %v197_v25, %v196_v24 }
   0xe   : > { %s706_s9 = smov (!%p164_p4, %s560_s9), 1 }
   0xf   : > { %s414_s21 = sshll.u32 %s706_s9, 3 }
  0x10   : > { %s167_s24 = scalar_lea.vmem %s696_s0, %s414_s21  ;;  %s180_s27 = scalar_lea.vmem %s698_s2, %s414_s21 }
  0x11   : > { %494 = vmatpush3.bf16.xpose.msk.msra.mxu0 %vm616_vm1, %v492_v8  ;;  %v181_v27 = vld [vmem:[%s167_s24] sm:$0xff] }
  0x12   : > { %495 = vmatprep.subr.bf16.mxu0 %v570_v2 }
  0x19   : > { %498 = vmatpush3.bf16.xpose.msk.msra.mxu0 %vm616_vm1, %v496_v11 }
  0x1a   : > { %499 = vmatprep.subr.bf16.mxu0 %v570_v2 }
  0x21   : > { %502 = vmatpush3.bf16.xpose.msk.msra.mxu0 %vm616_vm1, %v500_v14 }
  0x22   : > { %503 = vmatprep.subr.bf16.mxu0 %v570_v2 }
  0x29   : > { %506 = vmatpush3.bf16.xpose.msk.msra.mxu0 %vm616_vm1, %v504_v17 }
  0x2a   : > { %507 = vmatprep.subr.bf16.mxu0 %v570_v2 }
  0x31   : > { %510 = vmatpush3.bf16.xpose.msk.msra.mxu0 %vm616_vm1, %v508_v20 }
  0x32   : > { %511 = vmatprep.subr.bf16.mxu0 %v570_v2 }
  0x39   : > { %514 = vmatpush3.bf16.xpose.msk.msra.mxu0 %vm616_vm1, %v512_v23 }
  0x3a   : > { %515 = vmatprep.subr.bf16.mxu0 %v570_v2 }
  0x41   : > { %518 = vmatpush3.bf16.xpose.msk.msra.mxu0 %vm616_vm1, %v516_v26 }
  0x48   : > { %485 = vmatmul.mubr.msk.f32.vlgmr.msra.gmra.mrb[0].mxu0 %vm198_vm0, %v181_v27 }
 0x11b   : > { %v316_v28 = vpop.f32.mrb[0].mxu0 }
 0x11c   : > { %320 = vst [vmem:[%s180_s27] sm:$0xff] %v316_v28  ;;  %v486_v29 = vpop.f32.mrb[1].mxu0 }
 0x11d PF: > { %s12_s11 = sadd.s32 1, %s568_s11   ;;  %s701_s9 = smov %s564_s10 }
 0x11e   : > { %p9_p5 = scmp.ge.s32.totalorder %s12_s11, 4   ;;  %s702_s10 = smov %s704_s12 }
 0x120   :  { %11 = sbr.rel (!%p9_p5) target bundleno = 2 (0x2), region = 61 }

// kernel: attention_forward.3
= control target key start
LH: loop header
LB: loop body
LE: loop exit
PB: predicated region body
PF: predicated region fallthrough
CT: control target
= control target key end

     0   :  { %s808_s12 = smov 0   ;;  %s810_s13 = smov 0   ;;  %s871_s0 = inlined_call_operand.vmem [shape: f32[6,16,8], index: 0, kind: input, shape index: {}, may-alias: {0,1,2}]   ;;  %s872_s1 = inlined_call_operand.vmem [shape: f32[6,16,8], index: 1, kind: input, shape index: {}, may-alias: {0,1,2}]   ;;  %s873_s2 = inlined_call_operand.vmem [shape: f32[6,16,8], index: 2, kind: input, shape index: {}, may-alias: {0,1,2}]   ;;  %s874_s3 = inlined_call_operand.vmem [shape: f32[2,16,8], index: 3, kind: output, shape index: {}]  }
   0x1   :  { %s812_s14 = smov 0  }
   0x2 LB: > { %s32_s15 = sadd.s32 1, %s778_s13  ;;  %p686_p0 = scmp.ge.s32.totalorder %s782_s14, 1  ;;  %s782_s14 = sphi %s812_s14, %s13_s14   ;;  %s778_s13 = sphi %s810_s13, %s876_s13   ;;  %s774_s12 = sphi %s808_s12, %s875_s12  }
   0x3   : > { %p34_p1 = scmp.ge.s32.totalorder %s32_s15, 2  ;;  %p201_p2 = scmp.lt.s32.totalorder %s782_s14, 3 }
   0x5   : > { %s878_s15 = smov (%p34_p1, %s32_s15), 0  ;;  %p202_p3 = pnand %p686_p0, %p201_p2 }
   0x6   : > { %s257_s16 = sadd.s32 (!%p202_p3), 2, %s774_s12  ;;  %p249_p4 = scmp.lt.s32.totalorder (!%p202_p3), %s774_s12, 5  ;;  %vm289_vm0 = vcmask (!%p202_p3), 57344   ;;  %v784_v0 = vmov (!%p202_p3), 0.0|0.0   ;;  %vm292_vm1 = vcmask (!%p202_p3), 64512   ;;  %v785_v1 = vmov (!%p202_p3), -inf  }
   0x7   : > { %205 = sbr.rel (%p202_p3) target bundleno = 621 (0x26d), region = 32  ;;  %p258_p5 = scmp.lt.s32.totalorder (!%p202_p3), %s257_s16, 5  ;;  %723 = vmatprep.subr.bf16.mxu0 (!%p202_p3), %v784_v0  ;;  %290 = vst.msk [vmem:[#allocation2] sm:$0x1] (!%p202_p3), %vm289_vm0, %v785_v1  ;;  %v786_v2 = vmov (!%p202_p3), 0.0   ;;  %vm787_vm2 = vmmov (!%p202_p3), 0   ;;  %v425_v19 = vlaneseq (!%p202_p3) }
   0x8   : > { %291 = vst.msk [vmem:[#allocation3] sm:$0x1] (!%p202_p3), %vm289_vm0, %v786_v2  ;;  %715 = vmatprep.mubr.msk.f32.mxu0 (!%p202_p3), %vm787_vm2, %v786_v2  ;;  %vm337_vm3 = vcmask (!%p202_p3), 130048   ;;  %s267_s26 = sadd.s32 (!%p202_p3), 4, %s774_s12  ;;  %p277_p7 = scmp.lt.s32.totalorder (!%p202_p3), %s774_s12, 1 }
   0x9   : > { %293 = vst.msk [vmem:[#allocation4] sm:$0xff] (!%p202_p3), %vm292_vm1, %v786_v2  ;;  %294 = vst.msk [vmem:[#allocation4 + $0x8] sm:$0xff] (!%p202_p3), %vm292_vm1, %v786_v2  ;;  %p268_p6 = scmp.lt.s32.totalorder (!%p202_p3), %s267_s26, 5  ;;  %v426_v22 = vshrl.u32 (!%p202_p3), %v425_v19, 7 }
   0xb   : > { %v427_v26 = vsub.s32 (!%p202_p3), 0, %v426_v22 }
   0xe   : > { %s250_s17 = scalar_select %p249_p4, %s774_s12, 5  ;;  %v411_v24 = vld [vmem:[#allocation2] sm:$0x1] }
   0xf   : > { %s880_s16 = smov (!%p258_p5, %s257_s16), 5  ;;  %s882_s26 = smov (!%p268_p6, %s267_s26), 5  ;;  %v433_v42 = vld [vmem:[#allocation3] sm:$0x1] }
  0x10   : > { %s701_s18 = sshll.u32 %s250_s17, 4  ;;  %s702_s19 = sshll.u32 %s880_s16, 4  ;;  %v446_v47 = vld [vmem:[#allocation4 + $0x8] sm:$0xff]  ;;  %v445_v49 = vld [vmem:[#allocation4] sm:$0xff] }
  0x11   : > { %s256_s22 = scalar_lea.vmem %s871_s0, %s701_s18  ;;  %s265_s25 = scalar_lea.vmem %s872_s1, %s702_s19 }
  0x12   : > { %v295_v3 = vld [vmem:[%s256_s22] sm:$0xff]  ;;  %v296_v4 = vld [vmem:[%s256_s22 + $0x8] sm:$0xff]  ;;  %s703_s27 = sshll.u32 %s882_s26, 4  ;;  %s884_s12 = smov (!%p277_p7, %s774_s12), 1 }
  0x13   : > { %v301_v5 = vld [vmem:[%s265_s25] sm:$0xff]  ;;  %v297_v6 = vmul.f32 0.25, %v295_v3  ;;  %v298_v7 = vmul.f32 0.25, %v296_v4  ;;  %v302_v8 = vld [vmem:[%s265_s25 + $0x8] sm:$0xff]  ;;  %s275_s30 = scalar_lea.vmem %s873_s2, %s703_s27  ;;  %s704_s4 = sshll.u32 %s884_s12, 4 }
  0x14   : > { %305 = vxpose.xlu0.b32.start [1/2] (short) (narrow) %v301_v5, 8  ;;  %v455_v13 = vld [vmem:[%s275_s30] sm:$0xff]  ;;  %v456_v36 = vld [vmem:[%s275_s30 + $0x8] sm:$0xff]  ;;  %s284_s7 = scalar_lea.vmem %s874_s3, %s704_s4 }
  0x15   : > { %299 = vst.msk [vmem:[#allocation5] sm:$0xff] %vm292_vm1, %v297_v6  ;;  %300 = vst.msk [vmem:[#allocation5 + $0x8] sm:$0xff] %vm292_vm1, %v298_v7  ;;  %720 = vmatprep.mubr.msk.f32.mxu1 %vm292_vm1, %v455_v13 }
  0x18   : > { %306 = vxpose.xlu0.b32.end [2/2] (short) (narrow) %v302_v8, 8 }
  0x1c   : > { %v303_v9 = vld [vmem:[#allocation5] sm:$0xff]  ;;  %v304_v10 = vld [vmem:[#allocation5 + $0x8] sm:$0xff] }
  0x1d   : > { %v724_v11 = vpack.c.bf16 %v304_v10, %v303_v9 }
  0x1f   : > { %725 = vmatpush3.bf16.msra.mxu0 %v724_v11 }
  0x94   : > { %v321_v12 = vpop.trf.xlu0 }
  0x95   : > { %716 = vmatmul.mubr.msk.f32.vlgmr.msra.gmra.mrb[0].mxu0 %vm337_vm3, %v321_v12 }
 0x168   : > { %v407_v14 = vpop.f32.mrb[0].mxu0 }
 0x169   : > { %v413_v15 = vsel %vm292_vm1, %v407_v14, -inf  ;;  %v717_v16 = vpop.f32.mrb[1].mxu0 }
 0x16a   : > { %v414_v17 = vrot.slane %v413_v15, 4 }
 0x16c   : > { %v415_v18 = vmax.f32 %v413_v15, %v414_v17 }
 0x16e   : > { %v416_v20 = vrot.slane %v415_v18, 2 }
 0x170   : > { %v417_v21 = vmax.f32 %v415_v18, %v416_v20 }
 0x172   : > { %v418_v23 = vrot.slane %v417_v21, 1 }
 0x174   : > { %v419_v25 = vmax.f32 %v417_v21, %v418_v23 }
 0x176   : > { %v420_v27 = vmax.f32 %v411_v24, %v419_v25 }
 0x178   : > { %v421_v28 = vsub.f32 %v411_v24, %v420_v27  ;;  %v428_v29 = vrot.slane %v420_v27, %v427_v26  ;;  %542 = vst.msk [vmem:[#allocation2] sm:$0x1] %vm289_vm0, %v420_v27 }
 0x17a   : > { %v422_v30 = vmul.f32 1.442695, %v421_v28  ;;  %v430_v31 = vsub.f32 %v407_v14, %v428_v29 }
 0x17c   : > { %754 = vpow2.f32 %v422_v30  ;;  %v431_v32 = vmul.f32 1.442695, %v430_v31 }
 0x17e   : > { %756 = vpow2.f32 %v431_v32 }
 0x186   : > { %v755_v33 = vpop.eup %754 }
 0x187   : > { %v451_v34 = vrot.slane %v755_v33, %v427_v26  ;;  %v434_v44 = vmul.f32 %v755_v33, %v433_v42 }
 0x188   : > { %v757_v35 = vpop.eup %756 }
 0x189   : > { %v435_v37 = vsel %vm292_vm1, %v757_v35, 0.0  ;;  %718 = vmatprep.subr.mxu1 %v757_v35  ;;  %v454_v50 = vmul.f32 %v451_v34, %v446_v47  ;;  %v453_v52 = vmul.f32 %v451_v34, %v445_v49 }
 0x18a   : > { %v436_v38 = vrot.slane %v435_v37, 4  ;;  %719 = vmatpush3.msra.mxu1 %v757_v35 }
 0x18b   : > { %721 = vmatmul.mubr.msk.f32.vlgmr.msra.gmra.mrb[0].mxu1 %vm292_vm1, %v456_v36 }
 0x18c   : > { %v437_v39 = vadd.f32 %v436_v38, %v435_v37 }
 0x18e   : > { %v438_v40 = vrot.slane %v437_v39, 2 }
 0x190   : > { %v439_v41 = vadd.f32 %v438_v40, %v437_v39 }
 0x192   : > { %v440_v43 = vrot.slane %v439_v41, 1 }
 0x194   : > { %v441_v45 = vadd.f32 %v440_v43, %v439_v41 }
 0x196   : > { %v442_v46 = vadd.f32 %v441_v45, %v434_v44 }
 0x198   : > { %444 = vst.msk [vmem:[#allocation3] sm:$0x1] %vm289_vm0, %v442_v46 }
 0x19f   : > { %v698_v48 = vld [vmem:[#allocation3] ss:$0 sm:$0xff] }
 0x1a0   : > { %758 = vrcp.f32 %v698_v48 }
 0x1aa   : > { %v759_v56 = vpop.eup %758 }
 0x25e   : > { %v722_v51 = vpop.f32.mrb[0].mxu1 }
 0x25f   : > { %v539_v53 = vadd.f32 %v722_v51, %v454_v50  ;;  %v529_v54 = vpop.f32.mrb[1].mxu1 }
 0x260   : > { %v538_v55 = vadd.f32 %v529_v54, %v453_v52 }
 0x261   : > { %541 = vst.msk [vmem:[#allocation4 + $0x8] sm:$0xff] %vm292_vm1, %v539_v53 }
 0x262   : > { %540 = vst.msk [vmem:[#allocation4] sm:$0xff] %vm292_vm1, %v538_v55 }
 0x268   : > { %v547_v57 = vld [vmem:[#allocation4 + $0x8] sm:$0xff] }
 0x269   : > { %v557_v58 = vmul.f32 %v759_v56, %v547_v57  ;;  %v546_v59 = vld [vmem:[#allocation4] sm:$0xff] }
 0x26a   : > { %v556_v60 = vmul.f32 %v759_v56, %v546_v59 }
 0x26b   : > { %559 = vst.msk [vmem:[%s284_s7 + $0x8] sm:$0xff] %vm292_vm1, %v557_v58 }
 0x26c   : > { %558 = vst.msk [vmem:[%s284_s7] sm:$0xff] %vm292_vm1, %v556_v60 }
 0x26d PF: > { %s13_s14 = sadd.s32 1, %s782_s14   ;;  %s875_s12 = smov %s778_s13 }
 0x26e   : > { %p10_p8 = scmp.ge.s32.totalorder %s13_s14, 4   ;;  %s876_s13 = smov %s878_s15 }
 0x270   :  { %12 = sbr.rel (!%p10_p8) target bundleno = 2 (0x2), region = 76 }

</bundles_post_ra>
